<compile_context>
chip_gen: v7x
topology: tpu7x:2x2x1
jax: 0.10.0
libtpu: 0.0.40
codegen_flags: <defaults>
</compile_context>

<pallas_src>
import math
import jax
import jax.numpy as jnp
from jax.experimental import pallas as pl
from jax.experimental.pallas import tpu as pltpu


def _round_up(x, m):
    return (x + m - 1) // m * m


def _cdiv(a, b):
    return -(-a // b)


def _vmem_caps():
    """(budget_bytes_for_tile_choice, vmem_limit_bytes) from the local chip."""
    cap = 64 * 1024 * 1024          # v7x per-TensorCore size: safe default
    try:
        info = pltpu.get_tpu_info()
        cap = int(getattr(info, "vmem_capacity_bytes", cap)) or cap
    except Exception:
        pass
    cap = min(cap, 128 * 1024 * 1024)
    return int(cap * 0.65), int(cap * 0.75)


def _vmem_usage(tm, tk, Hp, Cp, single_k):
    """Estimated VMEM bytes: BlockSpec double-buffers every operand."""
    db = 2
    x_b = tm * tk * 2 * db                    # bf16 x tile
    w1_b = tk * Hp * 2 * db                   # bf16 w1 tile
    b1_b = Hp * 4 * db                        # f32 bias 1
    w2_b = Hp * Cp * 2 * db                   # bf16 w2 (resident)
    b2_b = Cp * 4 * db                        # f32 bias 2
    o_b = tm * Cp * 4 * db                    # f32 output tile
    acc = 0 if single_k else tm * Hp * 4      # f32 accumulator scratch
    return x_b + w1_b + b1_b + w2_b + b2_b + o_b + acc


def _choose_config(batch, k_real, Hp, Cp, budget):
    """Return (tm, tk, Bp, Kp, single_k)."""
    # >= 2 batch tiles when B > 16 so the "parallel" axis can be sharded
    # across v7x's two TensorCores; cap tm near 512 for v5e/v6e w1 reuse.
    n_i = 1 if batch <= 16 else max(2, _cdiv(batch, 512))
    tm = _round_up(_cdiv(batch, n_i), 16)

    Kp_min = _round_up(k_real, 128)           # minimal lane-aligned K

    while True:
        # Prefer single-shot K: no accumulator RMW, no per-K-step overhead.
        if _vmem_usage(tm, Kp_min, Hp, Cp, True) <= budget:
            return tm, Kp_min, _round_up(batch, tm), Kp_min, True
        # Tiled-K fallback: minimize padded K; tie-break toward larger tk.
        best_tk = 128
        for tk in (512, 256):
            if tk <= Kp_min and _round_up(k_real, tk) == Kp_min:
                best_tk = tk
                break
        if (_vmem_usage(tm, best_tk, Hp, Cp, False) <= budget) or tm <= 16:
            # TODO(synk): tile C / stream w2 when (Hp,Cp) alone exceeds the
            # budget (very large num_courses); not needed at these shapes.
            return tm, best_tk, _round_up(batch, tm), Kp_min, False
        tm = max(16, _round_up(tm // 2, 16))


def _mlp_kernel_single(x_ref, w1_ref, b1_ref, w2_ref, b2_ref, o_ref):
    """Single-shot: out = (x @ w1 + b1_eff) @ w2 + b2 (bf16 MXU, f32 accum)."""
    h = jnp.dot(x_ref[...], w1_ref[...], preferred_element_type=jnp.float32)
    h = h + b1_ref[...]
    out = jnp.dot(h.astype(jnp.bfloat16), w2_ref[...],
                  preferred_element_type=jnp.float32)
    o_ref[...] = (out + b2_ref[...]).astype(o_ref.dtype)


def _mlp_kernel_tiled(x_ref, w1_ref, b1_ref, w2_ref, b2_ref, o_ref, acc_ref):
    """acc = b1 + sum_k x_k @ w1_k ; at last k: out = acc @ w2 + b2."""
    k = pl.program_id(1)

    @pl.when(k == 0)
    def _init():
        acc_ref[...] = jnp.broadcast_to(b1_ref[...], acc_ref.shape)

    acc_ref[...] += jnp.dot(x_ref[...], w1_ref[...],
                            preferred_element_type=jnp.float32)

    @pl.when(k == pl.num_programs(1) - 1)
    def _finalize():
        h = acc_ref[...].astype(jnp.bfloat16)
        out = jnp.dot(h, w2_ref[...], preferred_element_type=jnp.float32)
        o_ref[...] = (out + b2_ref[...]).astype(o_ref.dtype)


def linear_predictor_mlp(x, w1, b1, w2, b2, *, tm, tk, single_k, vmem_limit):
    """x:(Bp,Kp) bf16; w1:(Kp,Hp) bf16; b1:(1,Hp) f32; w2:(Hp,Cp) bf16;
    b2:(1,Cp) f32 -> (Bp,Cp) f32.  Pre-padded: Bp%tm==0, Kp%tk==0,
    Hp%128==0, Cp%128==0."""
    Bp, Kp = x.shape
    Hp = w1.shape[1]
    Cp = w2.shape[1]

    if single_k:
        grid_spec = pltpu.PrefetchScalarGridSpec(
            num_scalar_prefetch=0,
            grid=(Bp // tm,),
            in_specs=[
                pl.BlockSpec((tm, Kp), lambda i: (i, 0)),   # x row-block
                pl.BlockSpec((Kp, Hp), lambda i: (0, 0)),   # w1 (resident)
                pl.BlockSpec((1, Hp), lambda i: (0, 0)),    # b1 (resident)
                pl.BlockSpec((Hp, Cp), lambda i: (0, 0)),   # w2 (resident)
                pl.BlockSpec((1, Cp), lambda i: (0, 0)),    # b2 (resident)
            ],
            out_specs=pl.BlockSpec((tm, Cp), lambda i: (i, 0)),
        )
        kernel = _mlp_kernel_single
        semantics = ("parallel",)
    else:
        grid_spec = pltpu.PrefetchScalarGridSpec(
            num_scalar_prefetch=0,
            grid=(Bp // tm, Kp // tk),
            in_specs=[
                pl.BlockSpec((tm, tk), lambda i, k: (i, k)),   # x tile
                pl.BlockSpec((tk, Hp), lambda i, k: (k, 0)),   # w1 (K-streamed)
                pl.BlockSpec((1, Hp), lambda i, k: (0, 0)),    # b1 (resident)
                pl.BlockSpec((Hp, Cp), lambda i, k: (0, 0)),   # w2 (resident)
                pl.BlockSpec((1, Cp), lambda i, k: (0, 0)),    # b2 (resident)
            ],
            out_specs=pl.BlockSpec((tm, Cp), lambda i, k: (i, 0)),
            scratch_shapes=[pltpu.VMEM((tm, Hp), jnp.float32)],
        )
        kernel = _mlp_kernel_tiled
        semantics = ("parallel", "arbitrary")

    return pl.pallas_call(
        kernel,
        out_shape=jax.ShapeDtypeStruct((Bp, Cp), jnp.float32),
        grid_spec=grid_spec,
        compiler_params=pltpu.CompilerParams(
            dimension_semantics=semantics,
            vmem_limit_bytes=vmem_limit,
        ),
    )(x, w1, b1, w2, b2)


class LinearPredictorJAX:
    """Deterministic JAX/Pallas re-implementation of LinearPredictor.forward."""

    def __init__(self, input_size, hidden_size, num_courses, num_actions,
                 global_max_seq_len, padding_mask, key):
        # The original module is only well-formed when the embedding width
        # (hidden_size) matches the input_size used to size linear_layer;
        # the padding-fold relies on the same relation, so make it explicit.
        assert input_size == hidden_size, \
            "LinearPredictor requires input_size == hidden_size"
        self.input_size = input_size
        self.hidden_size = hidden_size
        self.num_courses = num_courses
        self.num_actions = num_actions
        self.max_len = global_max_seq_len
        self.padding_mask = float(padding_mask)

        initrange = 1.0 / math.sqrt(hidden_size / 2)
        k0, k1, k2, k3 = jax.random.split(key, 4)

        # course_emb: (num_courses+1, H), action_emb: (num_actions+1, H)
        self.course_emb = initrange * jax.random.normal(
            k0, (num_courses + 1, hidden_size), jnp.float32)
        self.action_emb = initrange * jax.random.normal(
            k1, (num_actions + 1, hidden_size), jnp.float32)

        feat = self.max_len * 2 * self.input_size
        C = num_courses + 1
        # PyTorch nn.Linear stores (out, in); we keep (in, out) for x @ W.
        self.w1 = initrange * jax.random.normal(
            k2, (feat, hidden_size), jnp.float32)
        self.b1 = jnp.full((1, hidden_size), 0.1, jnp.float32)
        self.w2 = initrange * jax.random.normal(
            k3, (hidden_size, C), jnp.float32)
        self.b2 = jnp.full((1, C), 0.1, jnp.float32)

        # --- pre-padded / bf16 kernel-side parameters (built once) ---
        self._feat = feat
        self._Fp = _round_up(feat, 128)          # >= any Kp the kernel uses
        self._Hp = _round_up(hidden_size, 128)   # lane-dense hidden dim
        self._Cp = _round_up(C, 128)             # lane-dense output dim
        self._vmem_budget, self._vmem_limit = _vmem_caps()

        # bf16 embedding tables: x is built in bf16 end-to-end so the kernel
        # input never round-trips HBM in f32.
        self._course_emb_bf16 = self.course_emb.astype(jnp.bfloat16)
        self._action_emb_bf16 = self.action_emb.astype(jnp.bfloat16)

        w1_pad = jnp.zeros((self._Fp, self._Hp), jnp.float32)
        w1_pad = w1_pad.at[:feat, :hidden_size].set(self.w1)
        self._w1_pad_bf16 = w1_pad.astype(jnp.bfloat16)

        w2_pad = jnp.zeros((self._Hp, self._Cp), jnp.float32)
        w2_pad = w2_pad.at[:hidden_size, :C].set(self.w2)
        self._w2_pad_bf16 = w2_pad.astype(jnp.bfloat16)

        self._b2_pad = jnp.zeros((1, self._Cp), jnp.float32).at[:, :C].set(self.b2)

    def forward(self, batch_cid, batch_action):
        batch_cid = jnp.asarray(batch_cid, jnp.int32)
        batch_action = jnp.asarray(batch_action, jnp.int32)
        assert batch_action.shape == batch_cid.shape
        B, S = batch_cid.shape
        H = self.hidden_size
        k_real = S * 2 * H                      # real (un-padded) feature width
        assert k_real <= self._feat, "seq_len exceeds global_max_seq_len"

        # bf16 embedding gathers + concat (cheap glue, plain JAX).
        # TODO(synk): could be fused into the kernel via scalar-prefetched
        # indices + Element-indexed BlockSpecs to skip the x HBM round trip.
        cid_emb = jnp.take(self._course_emb_bf16, batch_cid.reshape(-1),
                           axis=0).reshape(B, S, H)
        act_emb = jnp.take(self._action_emb_bf16, batch_action.reshape(-1),
                           axis=0).reshape(B, S, H)
        x = jnp.concatenate((cid_emb, act_emb), axis=-1).reshape(B, k_real)

        # Fold the constant padding_mask tail of the input into the layer-1
        # bias: padding contribution = padding_mask * sum(w1[k_real:feat]).
        pad_bias = self.padding_mask * jnp.sum(self.w1[k_real:, :], axis=0)
        b1_eff = self.b1 + pad_bias[None, :]
        b1_pad = jnp.zeros((1, self._Hp), jnp.float32).at[:, :H].set(b1_eff)

        tm, tk, Bp, Kp, single_k = _choose_config(
            B, k_real, self._Hp, self._Cp, self._vmem_budget)
        x_pad = jnp.pad(x, ((0, Bp - B), (0, Kp - k_real)))   # stays bf16
        w1_k = self._w1_pad_bf16[:Kp]           # only the real K range streams

        out_pad = linear_predictor_mlp(
            x_pad, w1_k, b1_pad, self._w2_pad_bf16, self._b2_pad,
            tm=tm, tk=tk, single_k=single_k, vmem_limit=self._vmem_limit)
        return out_pad[:B, :self.num_courses + 1]

    # TODO(synk): loss() / get_course_emb() are training/eval utilities, not
    # part of the forward pass; intentionally not ported.


if __name__ == "__main__":
    # Small, self-consistent shapes (input_size must equal the embedding dim
    # hidden_size for the original module's linear layer to be well-formed).
    input_size = 32
    hidden_size = 32
    num_courses = 10
    num_actions = 3
    max_len = 8
    padding_mask = 0.5   # nonzero to exercise the folded-padding path
    B, S = 2, 6          # seq_len < max_len exercises the padding branch

    key = jax.random.PRNGKey(0)
    model = LinearPredictorJAX(input_size, hidden_size, num_courses,
                               num_actions, max_len, padding_mask, key)

    kc, ka = jax.random.split(jax.random.PRNGKey(0))
    batch_cid = jax.random.randint(kc, (B, S), 0, num_courses + 1)
    batch_action = jax.random.randint(ka, (B, S), 0, num_actions + 1)

    out = model.forward(batch_cid, batch_action)
    jax.block_until_ready(out)
    assert out.shape == (B, num_courses + 1)

    # --- Reference 1: mirrors kernel numerics (bf16 operands, f32 accum) ---
    def ref_mirror(cid, act):
        ce = jnp.take(model.course_emb, cid.reshape(-1), axis=0).reshape(B, S, -1)
        ae = jnp.take(model.action_emb, act.reshape(-1), axis=0).reshape(B, S, -1)
        x = jnp.concatenate((ce, ae), axis=-1).reshape(B, -1)
        k_real = x.shape[-1]
        pad_bias = padding_mask * jnp.sum(model.w1[k_real:, :], axis=0)
        h = jnp.dot(x.astype(jnp.bfloat16),
                    model.w1[:k_real].astype(jnp.bfloat16),
                    preferred_element_type=jnp.float32) + model.b1 + pad_bias[None, :]
        return jnp.dot(h.astype(jnp.bfloat16), model.w2.astype(jnp.bfloat16),
                       preferred_element_type=jnp.float32) + model.b2

    expected = ref_mirror(batch_cid, batch_action)
    assert jnp.allclose(out, expected, atol=2e-2, rtol=2e-2)

    # --- Reference 2: fully f32, faithful to the PyTorch forward (loose) ---
    def ref_f32(cid, act):
        ce = jnp.take(model.course_emb, cid.reshape(-1), axis=0).reshape(B, S, -1)
        ae = jnp.take(model.action_emb, act.reshape(-1), axis=0).reshape(B, S, -1)
        x = jnp.concatenate((ce, ae), axis=-1).reshape(B, -1)
        feat = max_len * 2 * input_size
        pad = jnp.full((B, feat - x.shape[-1]), padding_mask, x.dtype)
        xf = jnp.concatenate((x, pad), axis=-1)
        h = xf @ model.w1 + model.b1
        return h @ model.w2 + model.b2

    expected_f32 = ref_f32(batch_cid, batch_action)
    assert jnp.allclose(out, expected_f32, atol=0.25, rtol=0.05)

    # --- Also exercise the tiled-K fallback kernel (force via tiny budget) ---
    model._vmem_budget = 256 * 1024
    out_tiled = model.forward(batch_cid, batch_action)
    jax.block_until_ready(out_tiled)
    assert out_tiled.shape == (B, num_courses + 1)
    assert jnp.allclose(out_tiled, expected, atol=2e-2, rtol=2e-2)

    print("KERNEL_OK")
</pallas_src>

<mosaic_0001>
module attributes {stable_mosaic.version = 11 : i64} {
  func.func @_mlp_kernel_single(%arg0: i32, %arg1: memref<16x384xbf16, #tpu.memory_space<vmem>>, %arg2: memref<384x128xbf16, #tpu.memory_space<vmem>>, %arg3: memref<1x128xf32, #tpu.memory_space<vmem>>, %arg4: memref<128x128xbf16, #tpu.memory_space<vmem>>, %arg5: memref<1x128xf32, #tpu.memory_space<vmem>>, %arg6: memref<16x128xf32, #tpu.memory_space<vmem>>) attributes {dimension_semantics = [#tpu.dimension_semantics<parallel>], iteration_bounds = array<i64: 1>, scalar_prefetch = 0 : i64, scratch_operands = 0 : i64, tpu.core_type = #tpu.core_type<tc>, window_params = [{transform_indices = @transform_0, window_bounds = array<i64: 16, 384>}, {pipeline_mode = #tpu.pipeline_mode<synchronous>, transform_indices = @transform_1, window_bounds = array<i64: 384, 128>}, {pipeline_mode = #tpu.pipeline_mode<synchronous>, transform_indices = @transform_2, window_bounds = array<i64: 1, 128>}, {pipeline_mode = #tpu.pipeline_mode<synchronous>, transform_indices = @transform_3, window_bounds = array<i64: 128, 128>}, {pipeline_mode = #tpu.pipeline_mode<synchronous>, transform_indices = @transform_4, window_bounds = array<i64: 1, 128>}, {transform_indices = @transform_5, window_bounds = array<i64: 16, 128>}]} {
    %c0 = arith.constant 0 : index
    %c0_0 = arith.constant 0 : index
    %0 = vector.load %arg1[%c0, %c0_0] : memref<16x384xbf16, #tpu.memory_space<vmem>>, vector<16x384xbf16>
    %c0_1 = arith.constant 0 : index
    %c0_2 = arith.constant 0 : index
    %1 = vector.load %arg2[%c0_1, %c0_2] : memref<384x128xbf16, #tpu.memory_space<vmem>>, vector<384x128xbf16>
    %cst = arith.constant dense<0.000000e+00> : vector<16x128xf32>
    %2 = tpu.matmul %0, %1, %cst {dimension_numbers = #tpu.dot_dimension_numbers<[1], [0], [0], [1], [0, 0, 1, 1], [], []>} : vector<16x384xbf16>, vector<384x128xbf16>, vector<16x128xf32> -> vector<16x128xf32>
    %c0_3 = arith.constant 0 : index
    %c0_4 = arith.constant 0 : index
    %3 = vector.load %arg3[%c0_3, %c0_4] : memref<1x128xf32, #tpu.memory_space<vmem>>, vector<1x128xf32>
    %4 = vector.broadcast %3 : vector<1x128xf32> to vector<16x128xf32>
    %5 = arith.addf %2, %4 : vector<16x128xf32>
    %6 = arith.truncf %5 : vector<16x128xf32> to vector<16x128xbf16>
    %c0_5 = arith.constant 0 : index
    %c0_6 = arith.constant 0 : index
    %7 = vector.load %arg4[%c0_5, %c0_6] : memref<128x128xbf16, #tpu.memory_space<vmem>>, vector<128x128xbf16>
    %cst_7 = arith.constant dense<0.000000e+00> : vector<16x128xf32>
    %8 = tpu.matmul %6, %7, %cst_7 {dimension_numbers = #tpu.dot_dimension_numbers<[1], [0], [0], [1], [0, 0, 1, 1], [], []>} : vector<16x128xbf16>, vector<128x128xbf16>, vector<16x128xf32> -> vector<16x128xf32>
    %c0_8 = arith.constant 0 : index
    %c0_9 = arith.constant 0 : index
    %9 = vector.load %arg5[%c0_8, %c0_9] : memref<1x128xf32, #tpu.memory_space<vmem>>, vector<1x128xf32>
    %10 = vector.broadcast %9 : vector<1x128xf32> to vector<16x128xf32>
    %11 = arith.addf %8, %10 : vector<16x128xf32>
    %c0_10 = arith.constant 0 : index
    %c0_11 = arith.constant 0 : index
    %12 = vector.load %arg6[%c0_10, %c0_11] : memref<16x128xf32, #tpu.memory_space<vmem>>, vector<16x128xf32>
    tpu.vector_store %arg6[%c0_10, %c0_11], %11 {strides = array<i32>} : memref<16x128xf32, #tpu.memory_space<vmem>>, vector<16x128xf32>,
    return
  }
  func.func @transform_0(%arg0: i32) -> (i32, i32) {
    %c0_i32 = arith.constant 0 : i32
    %c0_i32_0 = arith.constant 0 : i32
    return %arg0, %c0_i32 : i32, i32
  }
  func.func @transform_1(%arg0: i32) -> (i32, i32) {
    %c0_i32 = arith.constant 0 : i32
    %c0_i32_0 = arith.constant 0 : i32
    %c0_i32_1 = arith.constant 0 : i32
    return %c0_i32, %c0_i32_0 : i32, i32
  }
  func.func @transform_2(%arg0: i32) -> (i32, i32) {
    %c0_i32 = arith.constant 0 : i32
    %c0_i32_0 = arith.constant 0 : i32
    %c0_i32_1 = arith.constant 0 : i32
    return %c0_i32, %c0_i32_0 : i32, i32
  }
  func.func @transform_3(%arg0: i32) -> (i32, i32) {
    %c0_i32 = arith.constant 0 : i32
    %c0_i32_0 = arith.constant 0 : i32
    %c0_i32_1 = arith.constant 0 : i32
    return %c0_i32, %c0_i32_0 : i32, i32
  }
  func.func @transform_4(%arg0: i32) -> (i32, i32) {
    %c0_i32 = arith.constant 0 : i32
    %c0_i32_0 = arith.constant 0 : i32
    %c0_i32_1 = arith.constant 0 : i32
    return %c0_i32, %c0_i32_0 : i32, i32
  }
  func.func @transform_5(%arg0: i32) -> (i32, i32) {
    %c0_i32 = arith.constant 0 : i32
    %c0_i32_0 = arith.constant 0 : i32
    return %arg0, %c0_i32 : i32, i32
  }
}

</mosaic_0001>

<bundles_post_ra>
// kernel: tpu_custom_call.1
= control target key start
LH: loop header
LB: loop body
LE: loop exit
PB: predicated region body
PF: predicated region fallthrough
CT: control target
= control target key end

     0   :  { %10 = vsyncpa [#allocation3], 0  ;;  %s878_s0 = inlined_call_operand.hbm [shape: bf16[16,384], index: 0, kind: input, shape index: {}]   ;;  %s879_s1 = inlined_call_operand.hbm [shape: bf16[384,128], index: 1, kind: input, shape index: {}]   ;;  %s880_s2 = inlined_call_operand.vmem [shape: f32[1,128], index: 2, kind: input, shape index: {}]   ;;  %s881_s3 = inlined_call_operand.hbm [shape: bf16[128,128], index: 3, kind: input, shape index: {}]   ;;  %s882_s4 = inlined_call_operand.vmem [shape: f32[1,128], index: 4, kind: input, shape index: {}]   ;;  %s883_s5 = inlined_call_operand.hbm [shape: f32[16,128], index: 5, kind: output, shape index: {}]  }
   0x1   :  { %11 = vsyncpa [#allocation6], 0 }
   0x2   :  { %12 = vsyncpa [#allocation4], 0  ;;  %s756_s18 = smov [#allocation5]   ;;  %s662_s22 = scalar_lea.hbm %s879_s1, 3072 }
   0x3   :  { %s30_s19 = sshll.u32 %s756_s18, 4  ;;  %p663_p0 = scmp.ne.s32.totalorder %s879_s1, %s662_s22  ;;  %s31_s19 = int_to_ptr.vmem [resolvable:$true] %s30_s19 }
   0x4   :  { %p666_p1 = scmp.lt.u32.totalorder %s662_s22, %s879_s1 }
   0x6   :  { %p668_p2 = pnand %p666_p1, %p663_p0 }
   0x8   :  { %671 = shalt.err (!%p668_p2)
}
   0x9   :  { %s672_s27 = scalar_lea.vmem %s31_s19, 3072  ;;  %p677_p4 = scmp.lt.s32.totalorder %s31_s19, %s31_s19 }
   0xa   :  { %p673_p3 = scmp.ne.s32.totalorder %s31_s19, %s672_s27  ;;  %p678_p5 = scmp.lt.s32.totalorder %s672_s27, %s672_s27 }
   0xc   :  { %p679_p6 = por %p678_p5, %p677_p4 }
   0xe   :  { %p680_p7 = pnand %p679_p6, %p673_p3 }
  0x10   :  { %683 = shalt.err (!%p680_p7)
}
  0x11   :  { %s757_s28 = smov 64   ;;  %s758_s29 = smov 4  }
  0x12   :  { %36 = dma.hbm_to_vmem [thread:$0]  %s879_s1, 3072, %s31_s19, [#allocation6], %s757_s28, %s757_s28, %s758_s29  }
  0x13   :  { %s759_s7 = smov [#allocation2]   ;;  %s684_s11 = scalar_lea.hbm %s878_s0, 384 }
  0x14   :  { %s18_s8 = sshll.u32 %s759_s7, 4  ;;  %p685_p8 = scmp.ne.s32.totalorder %s878_s0, %s684_s11  ;;  %s19_s8 = int_to_ptr.vmem [resolvable:$true] %s18_s8 }
  0x15   :  { %p688_p9 = scmp.lt.u32.totalorder %s684_s11, %s878_s0 }
  0x17   :  { %p690_p10 = pnand %p688_p9, %p685_p8 }
  0x19   :  { %693 = shalt.err (!%p690_p10)
}
  0x1a   :  { %s694_s16 = scalar_lea.vmem %s19_s8, 384  ;;  %p699_p12 = scmp.lt.s32.totalorder %s19_s8, %s19_s8 }
  0x1b   :  { %p695_p11 = scmp.ne.s32.totalorder %s19_s8, %s694_s16  ;;  %p700_p13 = scmp.lt.s32.totalorder %s694_s16, %s694_s16 }
  0x1d   :  { %p701_p0 = por %p700_p13, %p699_p12 }
  0x1f   :  { %p702_p1 = pnand %p701_p0, %p695_p11 }
  0x21   :  { %705 = shalt.err (!%p702_p1)
}
  0x22   :  { %s760_s1 = smov 192   ;;  %s761_s17 = smov 12  }
  0x23   :  { %24 = dma.hbm_to_vmem [thread:$0]  %s878_s0, 384, %s19_s8, [#allocation3], %s760_s1, %s760_s1, %s761_s17  }
  0x24   :  { %s762_s20 = smov [#allocation7]   ;;  %s706_s24 = scalar_lea.hbm %s881_s3, 1024 }
  0x25   :  { %s44_s21 = sshll.u32 %s762_s20, 4  ;;  %p707_p2 = scmp.ne.s32.totalorder %s881_s3, %s706_s24  ;;  %s45_s21 = int_to_ptr.vmem [resolvable:$true] %s44_s21 }
  0x26   :  { %p710_p3 = scmp.lt.u32.totalorder %s706_s24, %s881_s3 }
  0x28   :  { %p712_p4 = pnand %p710_p3, %p707_p2 }
  0x2a   :  { %715 = shalt.err (!%p712_p4)
}
  0x2b   :  { %s716_s6 = scalar_lea.vmem %s45_s21, 1024  ;;  %p721_p6 = scmp.lt.s32.totalorder %s45_s21, %s45_s21 }
  0x2c   :  { %p717_p5 = scmp.ne.s32.totalorder %s45_s21, %s716_s6  ;;  %p722_p7 = scmp.lt.s32.totalorder %s716_s6, %s716_s6 }
  0x2e   :  { %p723_p8 = por %p722_p7, %p721_p6 }
  0x30   :  { %p724_p9 = pnand %p723_p8, %p717_p5 }
  0x32   :  { %727 = shalt.err (!%p724_p9)
}
  0x33   :  { %50 = dma.hbm_to_vmem [thread:$0]  %s881_s3, 1024, %s45_s21, [#allocation6], %s757_s28, %s757_s28, %s758_s29  }
  0x34   :  { %750 = dma.done.wait [#allocation3], 384  }
  0x35   :  { %751 = vsyncadd [#allocation3], 4294966912 }
  0x36   :  { %752 = dma.done.wait [#allocation6], 4096  }
  0x37   :  { %753 = vsyncadd [#allocation6], 4294963200  ;;  %v763_v0 = vmov 0.0   ;;  %vm764_vm0 = vmmov 0   ;;  %v626_v1 = vld [vmem:[#allocation5 + $0x40] sm:$0xff]   ;;  %v629_v4 = vld [vmem:[#allocation5 + $0x48] sm:$0xff]  }
  0x38   :  { %574 = vmatprep.subr.bf16.mxu1 %v763_v0  ;;  %590 = vmatprep.mubr.msk.bf16.mxu1 %vm764_vm0, %v763_v0  ;;  %v627_v2 = vld [vmem:[#allocation5] sm:$0xff]   ;;  %v630_v5 = vld [vmem:[#allocation5 + $0x8] sm:$0xff]   ;;  %v632_v7 = vld [vmem:[#allocation5 + $0x50] sm:$0xff]   ;;  %s765_s9 = smov [#allocation8]  }
  0x39   :  { %534 = vmatprep.subr.bf16.mxu0 %v626_v1  ;;  %v628_v3 = vld [vmem:[#allocation5 + $0x80] sm:$0xff]   ;;  %v631_v6 = vld [vmem:[#allocation5 + $0x88] sm:$0xff]   ;;  %v633_v8 = vld [vmem:[#allocation5 + $0x10] sm:$0xff]  }
  0x3a   :  { %535 = vmatpush3.bf16.msra.mxu0 %v627_v2  ;;  %575 = vmatpush3.bf16.msra.mxu1 %v628_v3  ;;  %v634_v9 = vld [vmem:[#allocation5 + $0x90] sm:$0xff]   ;;  %v635_v10 = vld [vmem:[#allocation5 + $0x58] sm:$0xff]   ;;  %v638_v13 = vld [vmem:[#allocation5 + $0x60] sm:$0xff]  }
  0x3b   :  { %536 = vmatprep.subr.bf16.mxu0 %v629_v4  ;;  %576 = vmatprep.subr.bf16.mxu1 %v763_v0  ;;  %v636_v11 = vld [vmem:[#allocation5 + $0x18] sm:$0xff]   ;;  %v639_v14 = vld [vmem:[#allocation5 + $0x20] sm:$0xff]   ;;  %v641_v16 = vld [vmem:[#allocation5 + $0x68] sm:$0xff]  }
  0x3c   :  { %v637_v12 = vld [vmem:[#allocation5 + $0x98] sm:$0xff]   ;;  %v640_v15 = vld [vmem:[#allocation5 + $0xa0] sm:$0xff]   ;;  %v642_v17 = vld [vmem:[#allocation5 + $0x28] sm:$0xff]  }
  0x3d   :  { %v643_v18 = vld [vmem:[#allocation5 + $0xa8] sm:$0xff]   ;;  %v644_v19 = vld [vmem:[#allocation5 + $0x70] sm:$0xff]   ;;  %v647_v22 = vld [vmem:[#allocation5 + $0x78] sm:$0xff]  }
  0x3e   :  { %537 = vmatpush3.bf16.msra.mxu0 %v630_v5  ;;  %577 = vmatpush3.bf16.msra.mxu1 %v631_v6  ;;  %v645_v20 = vld [vmem:[#allocation5 + $0x30] sm:$0xff]   ;;  %v651_v23 = vld [vmem:[#allocation2 + $0x4] ss:$12 sps:$4 sm:$0xff]   ;;  %v654_v28 = vld [vmem:[#allocation7] sm:$0xff]  }
  0x3f   :  { %538 = vmatprep.subr.bf16.mxu0 %v632_v7  ;;  %578 = vmatprep.subr.bf16.mxu1 %v763_v0  ;;  %v646_v21 = vld [vmem:[#allocation5 + $0xb0] sm:$0xff]   ;;  %v648_v24 = vld [vmem:[#allocation5 + $0x38] sm:$0xff]   ;;  %v655_v29 = vld [vmem:[#allocation7 + $0x8] sm:$0xff]  }
  0x40   :  { %314 = vmatprep.mubr.bf16.mxu0 %v651_v23  ;;  %v652_v25 = vld [vmem:[#allocation5 + $0xb8] sm:$0xff]   ;;  %v649_v26 = vld [vmem:[#allocation2] ss:$12 sps:$4 sm:$0xff]   ;;  %v658_v32 = vld [vmem:[#allocation7 + $0x20] sm:$0xff]  }
  0x41   :  { %v653_v27 = vld [vmem:[#allocation2 + $0x8] ss:$12 sps:$4 sm:$0xff]   ;;  %v659_v33 = vld [vmem:[#allocation7 + $0x28] sm:$0xff]  }
  0x42   :  { %539 = vmatpush3.bf16.msra.mxu0 %v633_v8  ;;  %579 = vmatpush3.bf16.msra.mxu1 %v634_v9  ;;  %v656_v30 = vld [vmem:[#allocation7 + $0x10] sm:$0xff]   ;;  %v657_v31 = vld [vmem:[#allocation7 + $0x18] sm:$0xff]   ;;  %v497_v38 = vld [vmem:[%s880_s2] ss:$0 sm:$0xff]  ;;  %s484_s2 = sshll.u32 %s765_s9, 4  ;;  %s485_s2 = int_to_ptr.vmem [resolvable:$true] %s484_s2 }
  0x43   :  { %540 = vmatprep.subr.bf16.mxu0 %v635_v10  ;;  %580 = vmatprep.subr.bf16.mxu1 %v763_v0  ;;  %v660_v34 = vld [vmem:[#allocation7 + $0x30] sm:$0xff]   ;;  %v661_v35 = vld [vmem:[#allocation7 + $0x38] sm:$0xff]   ;;  %v525_v52 = vld [vmem:[%s882_s4] ss:$0 sm:$0xff]  ;;  %s728_s10 = scalar_lea.vmem %s485_s2, 256  ;;  %p733_p11 = scmp.lt.s32.totalorder %s485_s2, %s485_s2 }
  0x44   :  { %p729_p10 = scmp.ne.s32.totalorder %s485_s2, %s728_s10  ;;  %p734_p12 = scmp.lt.s32.totalorder %s728_s10, %s728_s10 }
  0x46   :  { %541 = vmatpush3.bf16.msra.mxu0 %v636_v11  ;;  %581 = vmatpush3.bf16.msra.mxu1 %v637_v12  ;;  %p735_p13 = por %p734_p12, %p733_p11 }
  0x47   :  { %542 = vmatprep.subr.bf16.mxu0 %v638_v13  ;;  %582 = vmatprep.subr.bf16.mxu1 %v763_v0 }
  0x48   :  { %p736_p0 = pnand %p735_p13, %p729_p10 }
  0x4a   :  { %543 = vmatpush3.bf16.msra.mxu0 %v639_v14  ;;  %583 = vmatpush3.bf16.msra.mxu1 %v640_v15 }
  0x4b   :  { %544 = vmatprep.subr.bf16.mxu0 %v641_v16  ;;  %584 = vmatprep.subr.bf16.mxu1 %v763_v0 }
  0x4e   :  { %545 = vmatpush3.bf16.msra.mxu0 %v642_v17  ;;  %585 = vmatpush3.bf16.msra.mxu1 %v643_v18 }
  0x4f   :  { %546 = vmatprep.subr.bf16.mxu0 %v644_v19  ;;  %586 = vmatprep.subr.bf16.mxu1 %v763_v0 }
  0x52   :  { %547 = vmatpush3.bf16.msra.mxu0 %v645_v20  ;;  %587 = vmatpush3.bf16.msra.mxu1 %v646_v21 }
  0x53   :  { %548 = vmatprep.subr.bf16.mxu0 %v647_v22  ;;  %588 = vmatprep.subr.bf16.mxu1 %v763_v0 }
  0x56   :  { %549 = vmatpush3.bf16.msra.mxu0 %v648_v24  ;;  %589 = vmatpush3.bf16.msra.mxu1 %v652_v25 }
  0x57   :  { %594 = vmatprep.subr.bf16.mxu0 %v763_v0 }
  0x59   :  { %315 = vmatmul.mubr.bf16.vlgmr.msra.gmra.mrb[0].mxu0 %v649_v26  ;;  %591 = vmatmul.mubr.bf16.vlgmr.msra.gmra.mrb[0].mxu1 %v653_v27 }
  0x5a   :  { %595 = vmatpush3.bf16.msra.mxu0 %v654_v28  ;;  %610 = vmatprep.mubr.msk.bf16.mxu0 %vm764_vm0, %v763_v0 }
  0x5b   :  { %596 = vmatprep.subr.bf16.mxu0 %v763_v0 }
  0x5e   :  { %597 = vmatpush3.bf16.msra.mxu0 %v655_v29 }
  0x5f   :  { %598 = vmatprep.subr.bf16.mxu0 %v763_v0 }
  0x62   :  { %599 = vmatpush3.bf16.msra.mxu0 %v656_v30 }
  0x63   :  { %600 = vmatprep.subr.bf16.mxu0 %v763_v0 }
  0x66   :  { %601 = vmatpush3.bf16.msra.mxu0 %v657_v31 }
  0x67   :  { %602 = vmatprep.subr.bf16.mxu0 %v763_v0 }
  0x6a   :  { %603 = vmatpush3.bf16.msra.mxu0 %v658_v32 }
  0x6b   :  { %604 = vmatprep.subr.bf16.mxu0 %v763_v0 }
  0x6e   :  { %605 = vmatpush3.bf16.msra.mxu0 %v659_v33 }
  0x6f   :  { %606 = vmatprep.subr.bf16.mxu0 %v763_v0 }
  0x72   :  { %607 = vmatpush3.bf16.msra.mxu0 %v660_v34 }
  0x73   :  { %608 = vmatprep.subr.bf16.mxu0 %v763_v0 }
  0x76   :  { %609 = vmatpush3.bf16.msra.mxu0 %v661_v35 }
 0x12c   :  { %v550_v36 = vpop.f32.mrb[0].mxu0  ;;  %v357_v39 = vpop.f32.mrb[0].mxu1 }
 0x12d   :  { %v551_v37 = vpop.f32.mrb[1].mxu0  ;;  %v592_v42 = vpop.f32.mrb[1].mxu1 }
 0x12e   :  { %v552_v40 = vadd.f32 %v551_v37, %v550_v36  ;;  %v553_v41 = vpop.f32.mrb[2].mxu0  ;;  %v360_v44 = vpop.f32.mrb[2].mxu1 }
 0x12f   :  { %v554_v43 = vpop.f32.mrb[3].mxu0  ;;  %v593_v47 = vpop.f32.mrb[3].mxu1 }
 0x130   :  { %v317_v45 = vadd.f32 %v552_v40, %v497_v38  ;;  %v555_v46 = vadd.f32 %v554_v43, %v553_v41 }
 0x132   :  { %v358_v48 = vadd.f32 %v357_v39, %v317_v45  ;;  %v320_v49 = vadd.f32 %v555_v46, %v497_v38 }
 0x134   :  { %v361_v50 = vadd.f32 %v360_v44, %v320_v49 }
 0x136   :  { %v364_v51 = vpack.c.bf16 %v361_v50, %v358_v48 }
 0x138   :  { %611 = vmatmul.mubr.bf16.vlgmr.msra.gmra.mrb[4].mxu0 %v364_v51 }
 0x20b   :  { %v470_v53 = vpop.f32.mrb[4].mxu0 }
 0x20c   :  { %v471_v54 = vadd.f32 %v525_v52, %v470_v53  ;;  %v612_v55 = vpop.f32.mrb[5].mxu0 }
 0x20d   :  { %v473_v56 = vpop.f32.mrb[6].mxu0 }
 0x20e   :  { %477 = vst [vmem:[#allocation8] sm:$0xff] %v471_v54  ;;  %v474_v57 = vadd.f32 %v525_v52, %v473_v56  ;;  %v613_v58 = vpop.f32.mrb[7].mxu0 }
 0x210   :  { %478 = vst [vmem:[#allocation8 + $0x8] sm:$0xff] %v474_v57 }
 0x211   :  { %739 = shalt.err (!%p736_p0)
}
 0x212   :  { %s740_s12 = scalar_lea.hbm %s883_s5, 256 }
 0x213   :  { %p741_p1 = scmp.ne.s32.totalorder %s883_s5, %s740_s12  ;;  %p744_p2 = scmp.lt.u32.totalorder %s740_s12, %s883_s5 }
 0x215   :  { %p746_p3 = pnand %p744_p2, %p741_p1 }
 0x217   :  { %749 = shalt.err (!%p746_p3)
}
 0x218   :  { %s766_s1 = smov 128   ;;  %s767_s17 = smov 8  }
 0x219   :  { %490 = dma.vmem_to_hbm [thread:$0]  %s485_s2, 256, %s883_s5, [#allocation4], %s766_s1, %s766_s1, %s767_s17  }
 0x21a   :  { %754 = dma.done.wait [#allocation4], 256  }
 0x21b   :  { %755 = vsyncadd [#allocation4], 4294967040 }
 0x21c   :  { %494 = vsyncpa [#allocation3], 1 }
 0x21d   :  { %495 = vsyncpa [#allocation6], 1 }
 0x21e   :  { %496 = vsyncpa [#allocation4], 1 }

</bundles_post_ra>
